<compile_context>
chip_gen: v6e
topology: v6e:2x2x1
jax: 0.10.0
libtpu: 0.0.40
codegen_flags: <defaults>
</compile_context>

<pallas_src>
import jax
import jax.numpy as jnp
from jax.experimental import pallas as pl
from jax.experimental.pallas import tpu as pltpu


# ---- "Option" hyper-params (PyTorch Option class not given; small values) ----
INPUT_SEQ_DIM = 16
HIDDEN_DIM = 32
OUTPUT_SEQ_DIM = 16
BATCH = 16

LANE = 128                 # TPU lane width; layer widths are zero-padded to it.
ONES_LANE = HIDDEN_DIM     # padded lane that carries a constant 1.0 (bias fold)

# Row layout of the packed bf16 parameter slab (rows x 128 lanes):
#   [  0: 16)  W1   (in = 16,  out 32 -> padded 128 lanes)
#   [ 16: 32)  B1   bias of layer 1 pre-broadcast to BATCH rows; also seeds
#              the 1.0 in lane ONES_LANE that later layers carry forward
#   [ 32:160)  W2   (128 x 128): w2 in [0:32, 0:32], b2 in row ONES_LANE,
#              and W2[ONES_LANE, ONES_LANE] = 1.0 (propagates the ones lane)
#   [160:288)  W3   same structure as W2
#   [288:416)  W4   (128 x 128): w4 in [0:32, 0:16], b4 in row ONES_LANE
# All block starts are multiples of 16 -> bf16 (16,128)-tile aligned.
_W1_R0 = 0
_B1_R0 = _W1_R0 + INPUT_SEQ_DIM          # 16
_W2_R0 = _B1_R0 + BATCH                  # 32
_W3_R0 = _W2_R0 + LANE                   # 160
_W4_R0 = _W3_R0 + LANE                   # 288
_SLAB_ROWS = _W4_R0 + LANE               # 416 (multiple of 8)


def _mlp_kernel(x_ref, slab_ref, o_ref):
    # Entire 4-layer MLP runs in VMEM on the whole batch in one invocation.
    # Layer 1: (B,16)bf16 @ (16,128)bf16 -> f32, plus a pre-broadcast,
    # sublane-aligned bias tile (which also injects 1.0 into ONES_LANE).
    w1 = slab_ref[_W1_R0:_W1_R0 + INPUT_SEQ_DIM, :]                 # bf16 view
    b1 = slab_ref[_B1_R0:_B1_R0 + BATCH, :].astype(jnp.float32)     # (B,128)
    y = jnp.dot(x_ref[...].astype(jnp.bfloat16), w1,
                preferred_element_type=jnp.float32) + b1
    y = jnp.maximum(y, 0.0)                                         # ReLU

    # Layers 2-4: a single dot each; the bias rides in through the constant
    # 1.0 carried in lane ONES_LANE (padded lanes stay exactly zero).
    for r0 in (_W2_R0, _W3_R0, _W4_R0):
        w = slab_ref[r0:r0 + LANE, :]                               # (128,128)
        y = jnp.dot(y.astype(jnp.bfloat16), w,
                    preferred_element_type=jnp.float32)
        y = jnp.maximum(y, 0.0)                                     # ReLU

    # Dropout(0.5) is the identity in eval mode.
    o_ref[...] = y[:, :OUTPUT_SEQ_DIM]                              # (B,16) f32


def pack_params(params):
    """Pack w1..w4 / b1..b4 into one lane-dense (_SLAB_ROWS, 128) bf16 slab."""
    slab = jnp.zeros((_SLAB_ROWS, LANE), jnp.float32)

    # Layer 1 weight block + pre-broadcast bias tile (seeds the ones lane).
    slab = slab.at[_W1_R0:_W1_R0 + INPUT_SEQ_DIM, :HIDDEN_DIM].set(params["w1"])
    b1_row = jnp.zeros((1, LANE), jnp.float32)
    b1_row = b1_row.at[0, :HIDDEN_DIM].set(params["b1"][0])
    b1_row = b1_row.at[0, ONES_LANE].set(1.0)
    slab = slab.at[_B1_R0:_B1_R0 + BATCH, :].set(
        jnp.broadcast_to(b1_row, (BATCH, LANE)))

    # Layers 2-4: bias folded into the ONES_LANE row of each 128x128 block.
    for r0, wk, bk, keep_ones in ((_W2_R0, "w2", "b2", True),
                                  (_W3_R0, "w3", "b3", True),
                                  (_W4_R0, "w4", "b4", False)):
        w = params[wk]
        fin, fout = w.shape
        slab = slab.at[r0:r0 + fin, :fout].set(w)
        slab = slab.at[r0 + ONES_LANE, :fout].set(params[bk][0])
        if keep_ones:   # carry the 1.0 forward for the next layer's bias fold
            slab = slab.at[r0 + ONES_LANE, ONES_LANE].set(1.0)

    return slab.astype(jnp.bfloat16)


@jax.jit
def liner_net_forward(x, slab):
    """x: (BATCH, INPUT_SEQ_DIM) float32; slab: bf16 slab from pack_params."""
    B = x.shape[0]
    return pl.pallas_call(
        _mlp_kernel,
        out_shape=jax.ShapeDtypeStruct((B, OUTPUT_SEQ_DIM), jnp.float32),
        in_specs=[
            pl.BlockSpec(memory_space=pltpu.MemorySpace.VMEM),  # x (whole array)
            pl.BlockSpec(memory_space=pltpu.MemorySpace.VMEM),  # packed params
        ],
        out_specs=pl.BlockSpec(memory_space=pltpu.MemorySpace.VMEM),
    )(x, slab)


def init_params(key):
    """Deterministic synthetic parameters, shapes matching the nn.Linear layers."""
    dims = [(INPUT_SEQ_DIM, HIDDEN_DIM),
            (HIDDEN_DIM, HIDDEN_DIM),
            (HIDDEN_DIM, HIDDEN_DIM),
            (HIDDEN_DIM, OUTPUT_SEQ_DIM)]
    params = {}
    for idx, (fin, fout) in enumerate(dims, start=1):
        key, kw, kb = jax.random.split(key, 3)
        bound = 1.0 / jnp.sqrt(fin)
        # Stored already transposed to (in, out) for y = x @ W + b.
        params[f"w{idx}"] = jax.random.uniform(
            kw, (fin, fout), jnp.float32, -bound, bound)
        params[f"b{idx}"] = jax.random.uniform(
            kb, (1, fout), jnp.float32, -bound, bound)
    return params


def reference_forward(x, params):
    """Pure-JAX reference mirroring the kernel's bf16 weight / f32 accum math."""
    y = x
    for idx in range(1, 5):
        w = params[f"w{idx}"].astype(jnp.bfloat16)
        b = params[f"b{idx}"].astype(jnp.bfloat16).astype(jnp.float32)
        z = jnp.dot(y.astype(jnp.bfloat16), w,
                    preferred_element_type=jnp.float32) + b
        y = jnp.maximum(z, 0.0)
    return y


if __name__ == "__main__":
    key = jax.random.PRNGKey(0)
    key, kx = jax.random.split(key)
    x = jax.random.normal(kx, (BATCH, INPUT_SEQ_DIM), jnp.float32)
    params = init_params(key)
    slab = pack_params(params)

    out = liner_net_forward(x, slab)
    out = jax.block_until_ready(out)

    ref = reference_forward(x, params)
    assert out.shape == (BATCH, OUTPUT_SEQ_DIM)
    # bf16 weights -> compare against a bf16-matched reference with a loose
    # tolerance (per perf review; the f32 1e-5 check no longer applies).
    assert jnp.allclose(out, ref, atol=1e-2, rtol=1e-2)

    print("KERNEL_OK")
</pallas_src>

<mosaic_0001>
module attributes {stable_mosaic.version = 11 : i64} {
  func.func @_mlp_kernel(%arg0: memref<16x16xf32, #tpu.memory_space<vmem>>, %arg1: memref<416x128xbf16, #tpu.memory_space<vmem>>, %arg2: memref<16x16xf32, #tpu.memory_space<vmem>>) attributes {dimension_semantics = [], scalar_prefetch = 0 : i64, scratch_operands = 0 : i64, tpu.core_type = #tpu.core_type<tc>} {
    %c0 = arith.constant 0 : index
    %c0_0 = arith.constant 0 : index
    %0 = vector.load %arg1[%c0, %c0_0] : memref<416x128xbf16, #tpu.memory_space<vmem>>, vector<16x128xbf16>
    %c16 = arith.constant 16 : index
    %c0_1 = arith.constant 0 : index
    %1 = vector.load %arg1[%c16, %c0_1] : memref<416x128xbf16, #tpu.memory_space<vmem>>, vector<16x128xbf16>
    %2 = arith.extf %1 : vector<16x128xbf16> to vector<16x128xf32>
    %c0_2 = arith.constant 0 : index
    %c0_3 = arith.constant 0 : index
    %3 = vector.load %arg0[%c0_2, %c0_3] : memref<16x16xf32, #tpu.memory_space<vmem>>, vector<16x16xf32>
    %4 = arith.truncf %3 : vector<16x16xf32> to vector<16x16xbf16>
    %cst = arith.constant dense<0.000000e+00> : vector<16x128xf32>
    %5 = tpu.matmul %4, %0, %cst {dimension_numbers = #tpu.dot_dimension_numbers<[1], [0], [0], [1], [0, 0, 1, 1], [], []>} : vector<16x16xbf16>, vector<16x128xbf16>, vector<16x128xf32> -> vector<16x128xf32>
    %6 = arith.addf %5, %2 : vector<16x128xf32>
    %cst_4 = arith.constant 0.000000e+00 : f32
    %7 = vector.broadcast %cst_4 : f32 to vector<16x128xf32>
    %8 = arith.maximumf %6, %7 : vector<16x128xf32>
    %c32 = arith.constant 32 : index
    %c0_5 = arith.constant 0 : index
    %9 = vector.load %arg1[%c32, %c0_5] : memref<416x128xbf16, #tpu.memory_space<vmem>>, vector<128x128xbf16>
    %10 = arith.truncf %8 : vector<16x128xf32> to vector<16x128xbf16>
    %cst_6 = arith.constant dense<0.000000e+00> : vector<16x128xf32>
    %11 = tpu.matmul %10, %9, %cst_6 {dimension_numbers = #tpu.dot_dimension_numbers<[1], [0], [0], [1], [0, 0, 1, 1], [], []>} : vector<16x128xbf16>, vector<128x128xbf16>, vector<16x128xf32> -> vector<16x128xf32>
    %cst_7 = arith.constant 0.000000e+00 : f32
    %12 = vector.broadcast %cst_7 : f32 to vector<16x128xf32>
    %13 = arith.maximumf %11, %12 : vector<16x128xf32>
    %c160 = arith.constant 160 : index
    %c0_8 = arith.constant 0 : index
    %14 = vector.load %arg1[%c160, %c0_8] : memref<416x128xbf16, #tpu.memory_space<vmem>>, vector<128x128xbf16>
    %15 = arith.truncf %13 : vector<16x128xf32> to vector<16x128xbf16>
    %cst_9 = arith.constant dense<0.000000e+00> : vector<16x128xf32>
    %16 = tpu.matmul %15, %14, %cst_9 {dimension_numbers = #tpu.dot_dimension_numbers<[1], [0], [0], [1], [0, 0, 1, 1], [], []>} : vector<16x128xbf16>, vector<128x128xbf16>, vector<16x128xf32> -> vector<16x128xf32>
    %cst_10 = arith.constant 0.000000e+00 : f32
    %17 = vector.broadcast %cst_10 : f32 to vector<16x128xf32>
    %18 = arith.maximumf %16, %17 : vector<16x128xf32>
    %c288 = arith.constant 288 : index
    %c0_11 = arith.constant 0 : index
    %19 = vector.load %arg1[%c288, %c0_11] : memref<416x128xbf16, #tpu.memory_space<vmem>>, vector<128x128xbf16>
    %20 = arith.truncf %18 : vector<16x128xf32> to vector<16x128xbf16>
    %cst_12 = arith.constant dense<0.000000e+00> : vector<16x128xf32>
    %21 = tpu.matmul %20, %19, %cst_12 {dimension_numbers = #tpu.dot_dimension_numbers<[1], [0], [0], [1], [0, 0, 1, 1], [], []>} : vector<16x128xbf16>, vector<128x128xbf16>, vector<16x128xf32> -> vector<16x128xf32>
    %cst_13 = arith.constant 0.000000e+00 : f32
    %22 = vector.broadcast %cst_13 : f32 to vector<16x128xf32>
    %23 = arith.maximumf %21, %22 : vector<16x128xf32>
    %24 = vector.extract_strided_slice %23 {offsets = [0, 0], sizes = [16, 16], strides = [1, 1]} : vector<16x128xf32> to vector<16x16xf32>
    %c0_14 = arith.constant 0 : index
    %c0_15 = arith.constant 0 : index
    %25 = vector.load %arg2[%c0_14, %c0_15] : memref<16x16xf32, #tpu.memory_space<vmem>>, vector<16x16xf32>
    tpu.vector_store %arg2[%c0_14, %c0_15], %24 {strides = array<i32>} : memref<16x16xf32, #tpu.memory_space<vmem>>, vector<16x16xf32>,
    return
  }
}

</mosaic_0001>

<bundles_post_ra>
// kernel: liner_net_forward.1
= control target key start
LH: loop header
LB: loop body
LE: loop exit
PB: predicated region body
PF: predicated region fallthrough
CT: control target
= control target key end

     0   :  { %7 = vsyncpa [#allocation3], 0  ;;  %s748_s0 = inlined_call_operand.hbm [shape: f32[16,16], index: 0, kind: input, shape index: {}]   ;;  %s749_s1 = inlined_call_operand.hbm [shape: bf16[416,128], index: 1, kind: input, shape index: {}]   ;;  %s750_s2 = inlined_call_operand.hbm [shape: f32[16,16], index: 2, kind: output, shape index: {}]  }
   0x1   :  { %8 = vsyncpa [#allocation6], 0 }
   0x2   :  { %9 = vsyncpa [#allocation4], 0  ;;  %s673_s9 = smov [#allocation2]  }
   0x3   :  { %s15_s10 = sshll.u32 %s673_s9, 4  ;;  %s16_s10 = int_to_ptr.vmem [resolvable:$true] %s15_s10 }
   0x4   :  { %s615_s11 = scalar_lea.vmem %s16_s10, 256  ;;  %p620_p1 = scmp.lt.s32.totalorder %s16_s10, %s16_s10 }
   0x5   :  { %p616_p0 = scmp.ne.s32.totalorder %s16_s10, %s615_s11  ;;  %p621_p2 = scmp.lt.s32.totalorder %s615_s11, %s615_s11 }
   0x7   :  { %p622_p3 = por %p621_p2, %p620_p1 }
   0x9   :  { %p623_p4 = pnand %p622_p3, %p616_p0 }
   0xb   :  { %626 = shalt.err (!%p623_p4)
}
   0xc   :  { %s674_s12 = smov 128   ;;  %s675_s13 = smov 8  }
   0xd   :  { %21 = dma.hbm_to_vmem [thread:$0]  %s748_s0, 256, %s16_s10, [#allocation3], %s674_s12, %s674_s12, %s675_s13  }
   0xe   :  { %s676_s16 = smov [#allocation5]  }
   0xf   :  { %s27_s17 = sshll.u32 %s676_s16, 4  ;;  %s28_s17 = int_to_ptr.vmem [resolvable:$true] %s27_s17 }
  0x10   :  { %s635_s18 = scalar_lea.vmem %s28_s17, 3328  ;;  %p640_p6 = scmp.lt.s32.totalorder %s28_s17, %s28_s17 }
  0x11   :  { %p636_p5 = scmp.ne.s32.totalorder %s28_s17, %s635_s18  ;;  %p641_p7 = scmp.lt.s32.totalorder %s635_s18, %s635_s18 }
  0x13   :  { %p642_p8 = por %p641_p7, %p640_p6 }
  0x15   :  { %p643_p9 = pnand %p642_p8, %p636_p5 }
  0x17   :  { %646 = shalt.err (!%p643_p9)
}
  0x18   :  { %s677_s19 = smov 64   ;;  %s678_s20 = smov 4  }
  0x19   :  { %33 = dma.hbm_to_vmem [thread:$0]  %s749_s1, 3328, %s28_s17, [#allocation6], %s677_s19, %s677_s19, %s678_s20  }
  0x1a   :  { %667 = dma.done.wait [#allocation3], 256  }
  0x1b   :  { %668 = vsyncadd [#allocation3], 4294967040 }
  0x1c   :  { %669 = dma.done.wait [#allocation6], 3328  }
  0x1d   :  { %670 = vsyncadd [#allocation6], 4294963968  ;;  %v679_v0 = vmov 0.0   ;;  %vm680_vm0 = vmmov 0   ;;  %v582_v1 = vld [vmem:[#allocation5] sm:$0xff]   ;;  %v47_v2 = vld [vmem:[#allocation2] sm:$0xff] }
  0x1e   :  { %507 = vmatprep.subr.bf16.mxu0 %v679_v0  ;;  %509 = vmatprep.mubr.msk.bf16.mxu0 %vm680_vm0, %v679_v0  ;;  %v48_v3 = vld [vmem:[#allocation2 + $0x8] sm:$0xff]  ;;  %vm56_vm1 = vcmask 130048   ;;  %v583_v5 = vld [vmem:[#allocation5 + $0x48] sm:$0xff]   ;;  %v584_v6 = vld [vmem:[#allocation5 + $0x40] sm:$0xff]   ;;  %s681_s0 = smov [#allocation7]  }
  0x1f   :  { %513 = vmatprep.subr.bf16.mxu1 %v679_v0  ;;  %529 = vmatprep.mubr.msk.bf16.mxu1 %vm680_vm0, %v679_v0  ;;  %v49_v4 = vpack.c.bf16 %v48_v3, %v47_v2  ;;  %v585_v7 = vld [vmem:[#allocation5 + $0x38] sm:$0xff]   ;;  %v586_v8 = vld [vmem:[#allocation5 + $0x30] sm:$0xff]   ;;  %v587_v9 = vld [vmem:[#allocation5 + $0x28] sm:$0xff]   ;;  %s434_s1 = sshll.u32 %s681_s0, 4  ;;  %s435_s1 = int_to_ptr.vmem [resolvable:$true] %s434_s1 }
  0x20   :  { %508 = vmatpush3.bf16.msra.mxu0 %v582_v1  ;;  %514 = vmatpush3.bf16.msra.mxu1 %v583_v5  ;;  %v588_v10 = vld [vmem:[#allocation5 + $0x20] sm:$0xff]   ;;  %v589_v11 = vld [vmem:[#allocation5 + $0x18] sm:$0xff]   ;;  %v590_v12 = vld [vmem:[#allocation5 + $0x10] sm:$0xff]   ;;  %s647_s23 = scalar_lea.vmem %s435_s1, 256  ;;  %p652_p11 = scmp.lt.s32.totalorder %s435_s1, %s435_s1 }
  0x21   :  { %533 = vmatprep.subr.bf16.mxu0 %v679_v0  ;;  %515 = vmatprep.subr.bf16.mxu1 %v679_v0  ;;  %v591_v13 = vld [vmem:[#allocation5 + $0x88] sm:$0xff]   ;;  %v592_v14 = vld [vmem:[#allocation5 + $0x80] sm:$0xff]   ;;  %v593_v15 = vld [vmem:[#allocation5 + $0x78] sm:$0xff]   ;;  %p648_p10 = scmp.ne.s32.totalorder %s435_s1, %s647_s23  ;;  %p653_p12 = scmp.lt.s32.totalorder %s647_s23, %s647_s23 }
  0x22   :  { %v594_v16 = vld [vmem:[#allocation5 + $0x70] sm:$0xff]   ;;  %v595_v17 = vld [vmem:[#allocation5 + $0x68] sm:$0xff]   ;;  %v596_v18 = vld [vmem:[#allocation5 + $0x60] sm:$0xff]  }
  0x23   :  { %510 = vmatmul.mubr.msk.bf16.vlgmr.msra.gmra.mxu0 %vm56_vm1, %v49_v4  ;;  %v477_v19 = vld [vmem:[#allocation5 + $0x8] sm:$0xff]   ;;  %v597_v31 = vld [vmem:[#allocation5 + $0x58] sm:$0xff]   ;;  %v598_v32 = vld [vmem:[#allocation5 + $0x50] sm:$0xff]   ;;  %p654_p13 = por %p653_p12, %p652_p11 }
  0x24   :  { %549 = vmatprep.mubr.msk.bf16.mxu0 %vm680_vm0, %v679_v0  ;;  %516 = vmatpush3.bf16.msra.mxu1 %v584_v6  ;;  %v475_v20 = vunpack.c.l.bf16 %v477_v19  ;;  %v476_v22 = vunpack.c.h.bf16 %v477_v19  ;;  %v599_v33 = vld [vmem:[#allocation5 + $0xc8] sm:$0xff]   ;;  %v600_v34 = vld [vmem:[#allocation5 + $0xc0] sm:$0xff]   ;;  %v601_v35 = vld [vmem:[#allocation5 + $0xb8] sm:$0xff]  }
  0x25   :  { %517 = vmatprep.subr.bf16.mxu1 %v679_v0  ;;  %534 = vmatpush3.bf16.msra.mxu0 %v591_v13  ;;  %v602_v36 = vld [vmem:[#allocation5 + $0xb0] sm:$0xff]   ;;  %v603_v37 = vld [vmem:[#allocation5 + $0xa8] sm:$0xff]   ;;  %v604_v38 = vld [vmem:[#allocation5 + $0xa0] sm:$0xff]   ;;  %p655_p0 = pnand %p654_p13, %p648_p10 }
  0x26   :  { %535 = vmatprep.subr.bf16.mxu0 %v679_v0  ;;  %v605_v46 = vld [vmem:[#allocation5 + $0x98] sm:$0xff]   ;;  %v606_v47 = vld [vmem:[#allocation5 + $0x90] sm:$0xff]  }
  0x28   :  { %518 = vmatpush3.bf16.msra.mxu1 %v585_v7 }
  0x29   :  { %519 = vmatprep.subr.bf16.mxu1 %v679_v0  ;;  %536 = vmatpush3.bf16.msra.mxu0 %v592_v14 }
  0x2a   :  { %537 = vmatprep.subr.bf16.mxu0 %v679_v0 }
  0x2c   :  { %520 = vmatpush3.bf16.msra.mxu1 %v586_v8 }
  0x2d   :  { %521 = vmatprep.subr.bf16.mxu1 %v679_v0  ;;  %538 = vmatpush3.bf16.msra.mxu0 %v593_v15 }
  0x2e   :  { %539 = vmatprep.subr.bf16.mxu0 %v679_v0 }
  0x30   :  { %522 = vmatpush3.bf16.msra.mxu1 %v587_v9 }
  0x31   :  { %523 = vmatprep.subr.bf16.mxu1 %v679_v0  ;;  %540 = vmatpush3.bf16.msra.mxu0 %v594_v16 }
  0x32   :  { %541 = vmatprep.subr.bf16.mxu0 %v679_v0 }
  0x34   :  { %524 = vmatpush3.bf16.msra.mxu1 %v588_v10 }
  0x35   :  { %525 = vmatprep.subr.bf16.mxu1 %v679_v0  ;;  %542 = vmatpush3.bf16.msra.mxu0 %v595_v17 }
  0x36   :  { %543 = vmatprep.subr.bf16.mxu0 %v679_v0 }
  0x38   :  { %526 = vmatpush3.bf16.msra.mxu1 %v589_v11 }
  0x39   :  { %527 = vmatprep.subr.bf16.mxu1 %v679_v0  ;;  %544 = vmatpush3.bf16.msra.mxu0 %v596_v18 }
  0x3a   :  { %545 = vmatprep.subr.bf16.mxu0 %v679_v0 }
  0x3c   :  { %528 = vmatpush3.bf16.msra.mxu1 %v590_v12 }
  0x3d   :  { %553 = vmatprep.subr.bf16.mxu1 %v679_v0  ;;  %546 = vmatpush3.bf16.msra.mxu0 %v597_v31 }
  0x3e   :  { %547 = vmatprep.subr.bf16.mxu0 %v679_v0 }
  0x41   :  { %548 = vmatpush3.bf16.msra.mxu0 %v598_v32 }
  0xe3   :  { %v94_v21 = vpop.f32.mrf.mxu0 }
  0xe4   :  { %v95_v24 = vadd.f32 %v475_v20, %v94_v21 }
  0xe5   :  { %v511_v23 = vpop.f32.mrf.mxu0 }
  0xe6   :  { %v101_v28 = vmax.f32 %v95_v24, 0.0 }
  0xe7   :  { %v97_v25 = vpop.f32.mrf.mxu0 }
  0xe8   :  { %v98_v26 = vadd.f32 %v476_v22, %v97_v25 }
  0xe9   :  { %v512_v27 = vpop.f32.mrf.mxu0 }
  0xea   :  { %v102_v29 = vmax.f32 %v98_v26, 0.0 }
  0xec   :  { %v119_v30 = vpack.c.bf16 %v102_v29, %v101_v28 }
  0xee   :  { %530 = vmatmul.mubr.bf16.vlgmr.msra.gmra.mxu1 %v119_v30 }
  0xef   :  { %569 = vmatprep.mubr.msk.bf16.mxu1 %vm680_vm0, %v679_v0  ;;  %554 = vmatpush3.bf16.msra.mxu1 %v599_v33 }
  0xf0   :  { %555 = vmatprep.subr.bf16.mxu1 %v679_v0 }
  0xf3   :  { %556 = vmatpush3.bf16.msra.mxu1 %v600_v34 }
  0xf4   :  { %557 = vmatprep.subr.bf16.mxu1 %v679_v0 }
  0xf7   :  { %558 = vmatpush3.bf16.msra.mxu1 %v601_v35 }
  0xf8   :  { %559 = vmatprep.subr.bf16.mxu1 %v679_v0 }
  0xfb   :  { %560 = vmatpush3.bf16.msra.mxu1 %v602_v36 }
  0xfc   :  { %561 = vmatprep.subr.bf16.mxu1 %v679_v0 }
  0xff   :  { %562 = vmatpush3.bf16.msra.mxu1 %v603_v37 }
 0x100   :  { %563 = vmatprep.subr.bf16.mxu1 %v679_v0 }
 0x103   :  { %564 = vmatpush3.bf16.msra.mxu1 %v604_v38 }
 0x104   :  { %565 = vmatprep.subr.bf16.mxu1 %v679_v0 }
 0x107   :  { %566 = vmatpush3.bf16.msra.mxu1 %v605_v46 }
 0x108   :  { %567 = vmatprep.subr.bf16.mxu1 %v679_v0 }
 0x10b   :  { %568 = vmatpush3.bf16.msra.mxu1 %v606_v47 }
 0x1ae   :  { %v202_v39 = vpop.f32.mrf.mxu1 }
 0x1af   :  { %v209_v42 = vmax.f32 %v202_v39, 0.0 }
 0x1b0   :  { %v531_v40 = vpop.f32.mrf.mxu1 }
 0x1b2   :  { %v205_v41 = vpop.f32.mrf.mxu1 }
 0x1b3   :  { %v210_v43 = vmax.f32 %v205_v41, 0.0 }
 0x1b4   :  { %v532_v44 = vpop.f32.mrf.mxu1 }
 0x1b5   :  { %v227_v45 = vpack.c.bf16 %v210_v43, %v209_v42 }
 0x1b7   :  { %550 = vmatmul.mubr.bf16.vlgmr.msra.gmra.mxu0 %v227_v45 }
 0x277   :  { %v310_v48 = vpop.f32.mrf.mxu0 }
 0x278   :  { %v317_v51 = vmax.f32 %v310_v48, 0.0 }
 0x279   :  { %v551_v49 = vpop.f32.mrf.mxu0 }
 0x27b   :  { %v313_v50 = vpop.f32.mrf.mxu0 }
 0x27c   :  { %v318_v52 = vmax.f32 %v313_v50, 0.0 }
 0x27d   :  { %v552_v53 = vpop.f32.mrf.mxu0 }
 0x27e   :  { %v335_v54 = vpack.c.bf16 %v318_v52, %v317_v51 }
 0x280   :  { %570 = vmatmul.mubr.bf16.vlgmr.msra.gmra.mxu1 %v335_v54 }
 0x340   :  { %v418_v55 = vpop.f32.mrf.mxu1 }
 0x341   :  { %v425_v56 = vmax.f32 %v418_v55, 0.0 }
 0x342   :  { %v571_v57 = vpop.f32.mrf.mxu1 }
 0x343   :  { %427 = vst.msk [vmem:[#allocation7] sm:$0xff] %vm56_vm1, %v425_v56 }
 0x344   :  { %v421_v58 = vpop.f32.mrf.mxu1 }
 0x345   :  { %v426_v59 = vmax.f32 %v421_v58, 0.0 }
 0x346   :  { %v572_v60 = vpop.f32.mrf.mxu1 }
 0x347   :  { %428 = vst.msk [vmem:[#allocation7 + $0x8] sm:$0xff] %vm56_vm1, %v426_v59 }
 0x348   :  { %658 = shalt.err (!%p655_p0)
}
 0x349   :  { %440 = dma.vmem_to_hbm [thread:$0]  %s435_s1, 256, %s750_s2, [#allocation4], %s674_s12, %s674_s12, %s675_s13  }
 0x34a   :  { %671 = dma.done.wait [#allocation4], 256  }
 0x34b   :  { %672 = vsyncadd [#allocation4], 4294967040 }
 0x34c   :  { %444 = vsyncpa [#allocation3], 1 }
 0x34d   :  { %445 = vsyncpa [#allocation6], 1 }
 0x34e   :  { %446 = vsyncpa [#allocation4], 1 }

</bundles_post_ra>
